<compile_context>
chip_gen: v7x
topology: tpu7x:2x2x1
jax: 0.10.0
libtpu: 0.0.40
codegen_flags: <defaults>
</compile_context>

<pallas_src>
from functools import partial

import jax
import jax.numpy as jnp
from jax.experimental import pallas as pl
from jax.experimental.pallas import tpu as pltpu


def _round_up(x, m):
    return ((x + m - 1) // m) * m


def _largest_divisor_leq(t, cap):
    for v in range(min(cap, t), 0, -1):
        if t % v == 0:
            return v
    return 1


# ---------------------------------------------------------------- Buffered(1) probe

_BUFFERED_OK = None


def _probe_copy_kernel(x_ref, o_ref):
    o_ref[...] = x_ref[...]


def _buffered_single_supported():
    """Check once whether pipeline_mode=pl.Buffered(1) compiles on this Pallas."""
    global _BUFFERED_OK
    if _BUFFERED_OK is not None:
        return _BUFFERED_OK
    try:
        spec = pl.BlockSpec((8, 128), lambda i: (0, 0), pipeline_mode=pl.Buffered(1))
        out = pl.pallas_call(
            _probe_copy_kernel,
            out_shape=jax.ShapeDtypeStruct((16, 128), jnp.float32),
            grid_spec=pltpu.PrefetchScalarGridSpec(
                num_scalar_prefetch=0,
                grid=(2,),
                in_specs=[spec],
                out_specs=pl.BlockSpec((8, 128), lambda i: (i, 0)),
            ),
        )(jnp.ones((8, 128), jnp.float32))
        jax.block_until_ready(out)
        _BUFFERED_OK = True
    except Exception:
        _BUFFERED_OK = False
    return _BUFFERED_OK


def _const_spec(shape):
    """BlockSpec with a constant index_map; single-buffered when supported."""
    ndim = len(shape)
    idx = lambda i, _n=ndim: (0,) * _n
    if _buffered_single_supported():
        return pl.BlockSpec(shape, idx, pipeline_mode=pl.Buffered(1))
    return pl.BlockSpec(shape, idx)


def _vmem_capacity_bytes():
    try:
        info = pltpu.get_tpu_info()
        for name in ("vmem_capacity_bytes", "vmem_size_bytes", "vmem_bytes"):
            cap = getattr(info, name, None)
            if cap:
                return int(cap)
    except Exception:
        pass
    return 64 << 20  # conservative fallback (v7x per-TC VMEM)


# ---------------------------------------------------------------- basin projection

def _basin_projection_kernel(era5_ref, bc_ref, bd_ref, we_ref, wc_ref, wd_ref, b_ref,
                             o_ref):
    tb, n, e = era5_ref.shape
    c = o_ref.shape[-1]
    # static (per-node) contribution: tiny matmuls, recomputed per grid step instead
    # of materializing a (T*N, BC+BD) broadcast in HBM.
    static = (jnp.dot(bc_ref[...].astype(jnp.bfloat16), wc_ref[...],
                      preferred_element_type=jnp.float32)
              + jnp.dot(bd_ref[...].astype(jnp.bfloat16), wd_ref[...],
                        preferred_element_type=jnp.float32)
              + b_ref[...])                                           # (N, C)
    dyn = jnp.dot(era5_ref[...].reshape(tb * n, e).astype(jnp.bfloat16), we_ref[...],
                  preferred_element_type=jnp.float32).reshape(tb, n, c)
    o_ref[...] = jnp.maximum(dyn + static[None], 0.0)


def basin_projection(era5_tm, bc, bd, we, wc, wd, b, *, tb):
    T, N, E = era5_tm.shape
    C = we.shape[1]
    return pl.pallas_call(
        _basin_projection_kernel,
        out_shape=jax.ShapeDtypeStruct((T, N, C), jnp.float32),
        grid_spec=pltpu.PrefetchScalarGridSpec(
            num_scalar_prefetch=0,
            grid=(T // tb,),
            in_specs=[pl.BlockSpec((tb, N, E), lambda i: (i, 0, 0)),
                      _const_spec(bc.shape),
                      _const_spec(bd.shape),
                      _const_spec(we.shape),
                      _const_spec(wc.shape),
                      _const_spec(wd.shape),
                      _const_spec(b.shape)],
            out_specs=pl.BlockSpec((tb, N, C), lambda i: (i, 0, 0)),
        ),
        compiler_params=pltpu.CompilerParams(dimension_semantics=("parallel",)),
    )(era5_tm, bc, bd, we, wc, wd, b)


# ---------------------------------------------------------------- GCLSTM block

def _gclstm_block_kernel(proj_ref, lhat_ref, h0_ref, c0_ref,
                         fcw_ref, wx_ref, wh_ref, bg_ref, brw_ref, v_ref,
                         out_ref, hout_ref, cout_ref,
                         h_scr, c_scr, xz_scr):
    # fcw (2,C,C) bf16:  fc1 W, fc2 W
    # wx  (C,4C)  bf16:  input->gates weight, gate order [i|f|c|o]
    # wh  (2,C,4C)bf16:  Theta0->gates, Theta1->gates
    # bg  (1,4C)  f32 :  fused gate bias (linear + conv biases)
    # brw (2,C,C) bf16:  hiddenBridge W, cellBridge W
    # V   (9,C)   f32 :  fc_b1, fc_b2, w_c_i, w_c_f, w_c_o, ln_gamma, ln_beta, br_bh, br_bc
    tb, n, c = proj_ref.shape
    t_idx = pl.program_id(0)

    @pl.when(t_idx == 0)
    def _():
        h_scr[...] = h0_ref[...]
        c_scr[...] = c0_ref[...]

    V = v_ref[...]
    # hoisted row-vector broadcasts (once per grid step, not per timestep)
    w_ci = pl.broadcast_to(V[2:3], (n, c))
    w_cf = pl.broadcast_to(V[3:4], (n, c))
    w_co = pl.broadcast_to(V[4:5], (n, c))
    gamma = pl.broadcast_to(V[5:6], (n, c))
    beta = pl.broadcast_to(V[6:7], (n, c))

    # ---- block.fc for the whole time tile at once (Dropout = identity, inference)
    x2 = proj_ref[...].reshape(tb * n, c)
    h1 = jnp.maximum(
        jnp.dot(x2.astype(jnp.bfloat16), fcw_ref[0],
                preferred_element_type=jnp.float32) + V[0:1], 0.0)
    xf = jnp.dot(h1.astype(jnp.bfloat16), fcw_ref[1],
                 preferred_element_type=jnp.float32) + V[1:2]         # (Tb*N, C)

    # ---- input-driven part of all 4 gate pre-activations, all Tb steps, one matmul.
    # Stored in VMEM scratch so the recurrence loads one (N,4C) slice per step.
    xz_scr[...] = (jnp.dot(xf.astype(jnp.bfloat16), wx_ref[...],
                           preferred_element_type=jnp.float32)
                   + bg_ref[...]).reshape(tb, n, 4 * c)

    lhat = lhat_ref[...]          # (N, N) bf16
    wh0 = wh_ref[0]               # (C, 4C) bf16
    wh1 = wh_ref[1]               # (C, 4C) bf16

    # ---- recurrence (peephole LSTM with ChebConv K=2 on the hidden state)
    def step(t, carry):
        H = h_scr[...]
        Cs = c_scr[...]
        Hb = H.astype(jnp.bfloat16)
        # ChebConv K=2: Theta0 @ H + Theta1 @ (Lhat H), Lhat = -D^{-1/2} A D^{-1/2}
        LH = jnp.dot(lhat, Hb, preferred_element_type=jnp.float32)    # (N, C)
        Z = (xz_scr[t]
             + jnp.dot(Hb, wh0, preferred_element_type=jnp.float32)
             + jnp.dot(LH.astype(jnp.bfloat16), wh1,
                       preferred_element_type=jnp.float32))           # (N, 4C)
        I = jax.nn.sigmoid(Z[:, 0:c] + w_ci * Cs)
        F = jax.nn.sigmoid(Z[:, c:2 * c] + w_cf * Cs)
        Cn = F * Cs + I * jnp.tanh(Z[:, 2 * c:3 * c])
        O = jax.nn.sigmoid(Z[:, 3 * c:4 * c] + w_co * Cn)             # peephole on NEW cell
        Hn = O * jnp.tanh(Cn)
        h_scr[...] = Hn
        c_scr[...] = Cn

        # LayerNorm over channels (eps=1e-5), then residual with the block input
        mu = jnp.mean(Hn, axis=-1, keepdims=True)
        var = jnp.mean((Hn - mu) ** 2, axis=-1, keepdims=True)
        ln = (Hn - mu) * jax.lax.rsqrt(var + 1e-5) * gamma + beta
        out_ref[t] = proj_ref[t] + ln
        return carry

    jax.lax.fori_loop(0, tb, step, 0, unroll=True)

    @pl.when(t_idx == pl.num_programs(0) - 1)
    def _():
        Hl = h_scr[...].astype(jnp.bfloat16)
        Cl = c_scr[...].astype(jnp.bfloat16)
        hout_ref[...] = jnp.tanh(
            jnp.dot(Hl, brw_ref[0], preferred_element_type=jnp.float32) + V[7:8])
        cout_ref[...] = (
            jnp.dot(Cl, brw_ref[1], preferred_element_type=jnp.float32) + V[8:9])


def _gclstm_vmem_bytes(tb, n, c, *, single_const):
    cb = 1 if single_const else 2
    f32, bf16 = 4, 2
    io = 2 * 2 * tb * n * c * f32                      # proj in + out, double-buffered
    lap = cb * n * n * bf16
    wts = cb * ((2 * c * c + c * 4 * c + 2 * c * 4 * c + 2 * c * c) * bf16
                + (4 * c + 9 * c) * f32)
    state = cb * 2 * n * c * f32 + 2 * 2 * n * c * f32  # h0/c0 in, hout/cout out
    scratch = (2 * n * c + tb * n * 4 * c) * f32        # h/c scratch + xz scratch
    inter = (2 * tb * n * c + 8 * n * c + tb * n * 4 * c) * f32  # fc / Z / gate temps
    return io + lap + wts + state + scratch + inter + (2 << 20)


def _pick_time_tile(T, n, c, budget, *, cap, single_const):
    best = 1
    for tb in range(1, min(cap, T) + 1):
        if T % tb == 0 and _gclstm_vmem_bytes(tb, n, c,
                                              single_const=single_const) <= budget:
            best = tb
    return best


def gclstm_block(proj_tm, lhat_bf16, h0, c0, blk, *, tb, vmem_limit):
    T, N, C = proj_tm.shape
    return pl.pallas_call(
        _gclstm_block_kernel,
        out_shape=(jax.ShapeDtypeStruct((T, N, C), jnp.float32),
                   jax.ShapeDtypeStruct((N, C), jnp.float32),
                   jax.ShapeDtypeStruct((N, C), jnp.float32)),
        grid_spec=pltpu.PrefetchScalarGridSpec(
            num_scalar_prefetch=0,
            grid=(T // tb,),
            in_specs=[
                pl.BlockSpec((tb, N, C), lambda i: (i, 0, 0)),
                _const_spec((N, N)),
                _const_spec((N, C)),
                _const_spec((N, C)),
                _const_spec(blk["fcw"].shape),
                _const_spec(blk["wx"].shape),
                _const_spec(blk["wh"].shape),
                _const_spec(blk["bg"].shape),
                _const_spec(blk["brw"].shape),
                _const_spec(blk["V"].shape),
            ],
            out_specs=[
                pl.BlockSpec((tb, N, C), lambda i: (i, 0, 0)),
                pl.BlockSpec((N, C), lambda i: (0, 0)),
                pl.BlockSpec((N, C), lambda i: (0, 0)),
            ],
            scratch_shapes=[pltpu.VMEM((N, C), jnp.float32),
                            pltpu.VMEM((N, C), jnp.float32),
                            pltpu.VMEM((tb, N, 4 * C), jnp.float32)],
        ),
        compiler_params=pltpu.CompilerParams(
            dimension_semantics=("arbitrary",),
            vmem_limit_bytes=int(vmem_limit)),
    )(proj_tm, lhat_bf16, h0, c0, blk["fcw"], blk["wx"], blk["wh"],
      blk["bg"], blk["brw"], blk["V"])


# ---------------------------------------------------------------- scatter(max)

def _scatter_max_kernel(num_segments, seg_ref, x_ref, o_ref):
    tt = x_ref.shape[0]
    seg = seg_ref[...]                                  # (N, 1) int32
    # TODO(synk): sorted-segment scalar-prefetch version would be O(N*C) per step.
    for t in range(tt):                                 # static small loop over tile
        x = x_ref[t]                                    # (N, C)
        rows = []
        for r in range(num_segments):
            m = jnp.max(jnp.where(seg == r, x, -jnp.inf), axis=0, keepdims=True)
            rows.append(jnp.where(m == -jnp.inf, 0.0, m))   # PyG scatter-max default 0
        o_ref[t] = jnp.concatenate(rows, axis=0)        # one (R, C) store per timestep


def scatter_max(proj_tm, seg, num_segments, *, tt):
    T, N, C = proj_tm.shape
    return pl.pallas_call(
        partial(_scatter_max_kernel, num_segments),
        out_shape=jax.ShapeDtypeStruct((T, num_segments, C), jnp.float32),
        grid_spec=pltpu.PrefetchScalarGridSpec(
            num_scalar_prefetch=0,
            grid=(T // tt,),
            in_specs=[_const_spec((N, 1)),
                      pl.BlockSpec((tt, N, C), lambda i: (i, 0, 0))],
            out_specs=pl.BlockSpec((tt, num_segments, C), lambda i: (i, 0, 0)),
        ),
        compiler_params=pltpu.CompilerParams(dimension_semantics=("parallel",)),
    )(seg, proj_tm)


# ---------------------------------------------------------------- river proj + CMAL head

def _river_head_kernel(n_mix, x_ref, wp_ref, bp_ref, wh_ref, bh_ref, o_ref):
    h = jnp.maximum(
        jnp.dot(x_ref[...].astype(jnp.bfloat16), wp_ref[...],
                preferred_element_type=jnp.float32) + bp_ref[...], 0.0)
    z = jnp.dot(h.astype(jnp.bfloat16), wh_ref[...],
                preferred_element_type=jnp.float32) + bh_ref[...]
    m = n_mix
    mu = z[:, 0:m]
    beta = jax.nn.softplus(z[:, m:2 * m])
    tau = jax.nn.sigmoid(z[:, 2 * m:3 * m])
    p = z[:, 3 * m:4 * m]
    p = p - jnp.max(p, axis=-1, keepdims=True)
    e = jnp.exp(p)
    pi = e * pl.reciprocal(jnp.sum(e, axis=-1, keepdims=True), approx=True)
    # single packed lane-dense output; split in the wrapper
    o_ref[...] = jnp.concatenate([mu, beta, tau, pi], axis=-1)


def river_head(x, wp, bp, wh, bh, n_mix, *, row_tile=512):
    rows, k = x.shape
    hh = wp.shape[1]
    tm = min(row_tile, _round_up(rows, 8))
    return pl.pallas_call(
        partial(_river_head_kernel, n_mix),
        out_shape=jax.ShapeDtypeStruct((rows, 4 * n_mix), jnp.float32),
        grid_spec=pltpu.PrefetchScalarGridSpec(
            num_scalar_prefetch=0,
            grid=(pl.cdiv(rows, tm),),
            in_specs=[pl.BlockSpec((tm, k), lambda i: (i, 0)),
                      _const_spec((k, hh)),
                      _const_spec((1, hh)),
                      _const_spec((hh, 4 * n_mix)),
                      _const_spec((1, 4 * n_mix))],
            out_specs=pl.BlockSpec((tm, 4 * n_mix), lambda i: (i, 0)),
        ),
        compiler_params=pltpu.CompilerParams(dimension_semantics=("parallel",)),
    )(x, wp, bp, wh, bh)


# ---------------------------------------------------------------- glue

def build_cheb_lhat(edge_index, num_nodes):
    # ChebConv scaled Laplacian, sym normalization, lambda_max=2:
    #   Lhat = 2L/lambda_max - I = -D^{-1/2} A D^{-1/2}
    src, dst = edge_index[0], edge_index[1]
    adj = jnp.zeros((num_nodes, num_nodes), jnp.float32).at[dst, src].add(1.0)
    deg = jnp.sum(adj, axis=1)
    dis = jnp.where(deg > 0, 1.0 / jnp.sqrt(jnp.maximum(deg, 1e-12)), 0.0)
    return -(dis[:, None] * adj * dis[None, :])


def inundation_gclstm_coder(inputs, params, state=(None, None)):
    era5 = inputs["era5"]                                   # (N, T, E)
    N, T, E = era5.shape
    C = params["basin_we"].shape[1]

    # time-major basin features (no (N,T,C)<->(T,N,C) transposes of the big tensor)
    era5_tm = jnp.transpose(era5, (1, 0, 2))                # (T, N, E)
    tbp = _largest_divisor_leq(T, 8)
    proj_tm = basin_projection(
        era5_tm, inputs["basinContinuous"], inputs["basinDiscrete"],
        params["basin_we"], params["basin_wc"], params["basin_wd"], params["basin_b"],
        tb=tbp)                                             # (T, N, C)

    lhat = build_cheb_lhat(inputs["edge_index"], N).astype(jnp.bfloat16)

    hidden, cell = state
    if hidden is None:
        hidden = jnp.zeros((N, C), jnp.float32)
    if cell is None:
        cell = jnp.zeros((N, C), jnp.float32)

    # generation-aware VMEM budgeting and time-tile selection
    cap_bytes = _vmem_capacity_bytes()
    budget = int(0.75 * cap_bytes)
    tb_cap = 16 if cap_bytes >= (96 << 20) else 8
    single = _buffered_single_supported()
    tb = _pick_time_tile(T, N, C, budget, cap=tb_cap, single_const=single)
    vmem_limit = int(min(budget,
                         max(_gclstm_vmem_bytes(tb, N, C, single_const=single),
                             16 << 20)))

    # sequential block chain: block b consumes block b-1's residual stream and state
    for blk in params["blocks"]:
        proj_tm, hidden, cell = gclstm_block(proj_tm, lhat, hidden, cell, blk,
                                             tb=tb, vmem_limit=vmem_limit)

    R = int(params["num_rivers"])
    seg = inputs["batch"].astype(jnp.int32).reshape(N, 1)
    tt = _largest_divisor_leq(T, 8)
    sampled = jnp.transpose(scatter_max(proj_tm, seg, R, tt=tt), (1, 0, 2))  # (R,T,C)

    rc = jnp.broadcast_to(inputs["riverContinuous"][:, None, :],
                          (R, T, inputs["riverContinuous"].shape[-1]))
    rd = jnp.broadcast_to(inputs["riverDiscrete"][:, None, :],
                          (R, T, inputs["riverDiscrete"].shape[-1]))
    river_x = jnp.concatenate([sampled, rc, rd], axis=-1).reshape(R * T, -1)

    n_mix = int(params["n_mix"])
    packed = river_head(river_x, params["river_w"], params["river_b"],
                        params["head_w"], params["head_b"], n_mix)
    packed = packed.reshape(R, T, 4 * n_mix)
    cast = tuple(packed[..., k * n_mix:(k + 1) * n_mix] for k in range(4))
    return cast, (hidden, cell)


def init_params(key, *, C, n_blocks, era5_dim, basin_cont, basin_disc,
                river_cont, river_disc, n_mix, num_rivers):
    ks = iter(jax.random.split(key, 64))

    def w(shape, scale=0.3, dtype=jnp.float32):
        return (scale * jax.random.normal(next(ks), shape, jnp.float32)).astype(dtype)

    params = {
        "basin_we": w((era5_dim, C), dtype=jnp.bfloat16),
        "basin_wc": w((basin_cont, C), dtype=jnp.bfloat16),
        "basin_wd": w((basin_disc, C), dtype=jnp.bfloat16),
        "basin_b": w((1, C), 0.1),
        "river_w": w((C + river_cont + river_disc, C), dtype=jnp.bfloat16),
        "river_b": w((1, C), 0.1),
        "head_w": w((C, 4 * n_mix), dtype=jnp.bfloat16),
        "head_b": w((1, 4 * n_mix), 0.1),
        "n_mix": n_mix,
        "num_rivers": num_rivers,
        "blocks": [],
    }
    for _ in range(n_blocks):
        params["blocks"].append({
            "fcw": w((2, C, C), 0.25, jnp.bfloat16),
            "wx": w((C, 4 * C), 0.25, jnp.bfloat16),       # input->gates [i|f|c|o]
            "wh": w((2, C, 4 * C), 0.25, jnp.bfloat16),    # Theta0, Theta1 ->gates
            "bg": w((1, 4 * C), 0.1),                      # fused gate + conv biases
            "brw": w((2, C, C), 0.25, jnp.bfloat16),       # hidden/cell bridge weights
            "V": jnp.concatenate([
                w((5, C), 0.1),                            # fc_b1, fc_b2, w_c_i/f/o
                jnp.ones((1, C), jnp.float32),             # LayerNorm gamma
                jnp.zeros((1, C), jnp.float32),            # LayerNorm beta
                w((2, C), 0.1),                            # bridge biases
            ], axis=0),
        })
    return params


if __name__ == "__main__":
    N, T, R = 8, 16, 2          # basin nodes, sequence length, rivers
    E, BC, BD, RC, RD = 4, 4, 4, 4, 4
    C, M, NUM_BLOCKS = 16, 3, 2

    key = jax.random.PRNGKey(0)
    keys = jax.random.split(key, 8)

    # undirected ring graph over the N basin nodes
    s = jnp.arange(N, dtype=jnp.int32)
    d = (s + 1) % N
    edge_index = jnp.stack([jnp.concatenate([s, d]), jnp.concatenate([d, s])], axis=0)

    inputs = {
        "era5": jax.random.normal(keys[0], (N, T, E), jnp.float32),
        "basinContinuous": jax.random.normal(keys[1], (N, BC), jnp.float32),
        "basinDiscrete": jax.random.normal(keys[2], (N, BD), jnp.float32),
        "riverContinuous": jax.random.normal(keys[3], (R, RC), jnp.float32),
        "riverDiscrete": jax.random.normal(keys[4], (R, RD), jnp.float32),
        "edge_index": edge_index,
        "batch": jnp.array([0, 0, 0, 0, 1, 1, 1, 1], jnp.int32),
    }

    params = init_params(
        keys[5], C=C, n_blocks=NUM_BLOCKS,
        era5_dim=E, basin_cont=BC, basin_disc=BD,
        river_cont=RC, river_disc=RD,
        n_mix=M, num_rivers=R)

    cast, state = inundation_gclstm_coder(inputs, params)
    jax.block_until_ready((cast, state))
    print("KERNEL_OK")
</pallas_src>

<mosaic_0001>
module attributes {stable_mosaic.version = 11 : i64} {
  func.func @_probe_copy_kernel(%arg0: i32, %arg1: memref<8x128xf32, #tpu.memory_space<vmem>>, %arg2: memref<8x128xf32, #tpu.memory_space<vmem>>) attributes {dimension_semantics = [#tpu.dimension_semantics<arbitrary>], iteration_bounds = array<i64: 2>, scalar_prefetch = 0 : i64, scratch_operands = 0 : i64, tpu.core_type = #tpu.core_type<tc>, window_params = [{pipeline_mode = #tpu.pipeline_mode<synchronous>, transform_indices = @transform_0, window_bounds = array<i64: 8, 128>}, {transform_indices = @transform_1, window_bounds = array<i64: 8, 128>}]} {
    %c0 = arith.constant 0 : index
    %c0_0 = arith.constant 0 : index
    %0 = vector.load %arg1[%c0, %c0_0] : memref<8x128xf32, #tpu.memory_space<vmem>>, vector<8x128xf32>
    %c0_1 = arith.constant 0 : index
    %c0_2 = arith.constant 0 : index
    %1 = vector.load %arg2[%c0_1, %c0_2] : memref<8x128xf32, #tpu.memory_space<vmem>>, vector<8x128xf32>
    tpu.vector_store %arg2[%c0_1, %c0_2], %0 {strides = array<i32>} : memref<8x128xf32, #tpu.memory_space<vmem>>, vector<8x128xf32>,
    return
  }
  func.func @transform_0(%arg0: i32) -> (i32, i32) {
    %c0_i32 = arith.constant 0 : i32
    %c0_i32_0 = arith.constant 0 : i32
    %c0_i32_1 = arith.constant 0 : i32
    return %c0_i32, %c0_i32_0 : i32, i32
  }
  func.func @transform_1(%arg0: i32) -> (i32, i32) {
    %c0_i32 = arith.constant 0 : i32
    %c0_i32_0 = arith.constant 0 : i32
    return %arg0, %c0_i32 : i32, i32
  }
}

module attributes {stable_mosaic.version = 11 : i64} {
  func.func @_basin_projection_kernel(%arg0: i32, %arg1: memref<8x8x4xf32, #tpu.memory_space<vmem>>, %arg2: memref<8x4xf32, #tpu.memory_space<vmem>>, %arg3: memref<8x4xf32, #tpu.memory_space<vmem>>, %arg4: memref<4x16xbf16, #tpu.memory_space<vmem>>, %arg5: memref<4x16xbf16, #tpu.memory_space<vmem>>, %arg6: memref<4x16xbf16, #tpu.memory_space<vmem>>, %arg7: memref<1x16xf32, #tpu.memory_space<vmem>>, %arg8: memref<8x8x16xf32, #tpu.memory_space<vmem>>) attributes {dimension_semantics = [#tpu.dimension_semantics<parallel>], iteration_bounds = array<i64: 2>, scalar_prefetch = 0 : i64, scratch_operands = 0 : i64, tpu.core_type = #tpu.core_type<tc>, window_params = [{transform_indices = @transform_0, window_bounds = array<i64: 8, 8, 4>}, {pipeline_mode = #tpu.pipeline_mode<synchronous>, transform_indices = @transform_1, window_bounds = array<i64: 8, 4>}, {pipeline_mode = #tpu.pipeline_mode<synchronous>, transform_indices = @transform_2, window_bounds = array<i64: 8, 4>}, {pipeline_mode = #tpu.pipeline_mode<synchronous>, transform_indices = @transform_3, window_bounds = array<i64: 4, 16>}, {pipeline_mode = #tpu.pipeline_mode<synchronous>, transform_indices = @transform_4, window_bounds = array<i64: 4, 16>}, {pipeline_mode = #tpu.pipeline_mode<synchronous>, transform_indices = @transform_5, window_bounds = array<i64: 4, 16>}, {pipeline_mode = #tpu.pipeline_mode<synchronous>, transform_indices = @transform_6, window_bounds = array<i64: 1, 16>}, {transform_indices = @transform_7, window_bounds = array<i64: 8, 8, 16>}]} {
    %c0 = arith.constant 0 : index
    %c0_0 = arith.constant 0 : index
    %0 = vector.load %arg2[%c0, %c0_0] : memref<8x4xf32, #tpu.memory_space<vmem>>, vector<8x4xf32>
    %1 = arith.truncf %0 : vector<8x4xf32> to vector<8x4xbf16>
    %c0_1 = arith.constant 0 : index
    %c0_2 = arith.constant 0 : index
    %2 = vector.load %arg5[%c0_1, %c0_2] : memref<4x16xbf16, #tpu.memory_space<vmem>>, vector<4x16xbf16>
    %cst = arith.constant dense<0.000000e+00> : vector<8x16xf32>
    %3 = tpu.matmul %1, %2, %cst {dimension_numbers = #tpu.dot_dimension_numbers<[1], [0], [0], [1], [0, 0, 1, 1], [], []>} : vector<8x4xbf16>, vector<4x16xbf16>, vector<8x16xf32> -> vector<8x16xf32>
    %c0_3 = arith.constant 0 : index
    %c0_4 = arith.constant 0 : index
    %4 = vector.load %arg3[%c0_3, %c0_4] : memref<8x4xf32, #tpu.memory_space<vmem>>, vector<8x4xf32>
    %5 = arith.truncf %4 : vector<8x4xf32> to vector<8x4xbf16>
    %c0_5 = arith.constant 0 : index
    %c0_6 = arith.constant 0 : index
    %6 = vector.load %arg6[%c0_5, %c0_6] : memref<4x16xbf16, #tpu.memory_space<vmem>>, vector<4x16xbf16>
    %cst_7 = arith.constant dense<0.000000e+00> : vector<8x16xf32>
    %7 = tpu.matmul %5, %6, %cst_7 {dimension_numbers = #tpu.dot_dimension_numbers<[1], [0], [0], [1], [0, 0, 1, 1], [], []>} : vector<8x4xbf16>, vector<4x16xbf16>, vector<8x16xf32> -> vector<8x16xf32>
    %8 = arith.addf %3, %7 : vector<8x16xf32>
    %c0_8 = arith.constant 0 : index
    %c0_9 = arith.constant 0 : index
    %9 = vector.load %arg7[%c0_8, %c0_9] : memref<1x16xf32, #tpu.memory_space<vmem>>, vector<1x16xf32>
    %10 = vector.broadcast %9 : vector<1x16xf32> to vector<8x16xf32>
    %11 = arith.addf %8, %10 : vector<8x16xf32>
    %c0_10 = arith.constant 0 : index
    %c0_11 = arith.constant 0 : index
    %c0_12 = arith.constant 0 : index
    %12 = vector.load %arg1[%c0_10, %c0_11, %c0_12] : memref<8x8x4xf32, #tpu.memory_space<vmem>>, vector<8x8x4xf32>
    %13 = vector.shape_cast %12 : vector<8x8x4xf32> to vector<64x4xf32>
    %14 = arith.truncf %13 : vector<64x4xf32> to vector<64x4xbf16>
    %c0_13 = arith.constant 0 : index
    %c0_14 = arith.constant 0 : index
    %15 = vector.load %arg4[%c0_13, %c0_14] : memref<4x16xbf16, #tpu.memory_space<vmem>>, vector<4x16xbf16>
    %cst_15 = arith.constant dense<0.000000e+00> : vector<64x16xf32>
    %16 = tpu.matmul %14, %15, %cst_15 {dimension_numbers = #tpu.dot_dimension_numbers<[1], [0], [0], [1], [0, 0, 1, 1], [], []>} : vector<64x4xbf16>, vector<4x16xbf16>, vector<64x16xf32> -> vector<64x16xf32>
    %17 = vector.shape_cast %16 : vector<64x16xf32> to vector<8x8x16xf32>
    %18 = vector.shape_cast %11 : vector<8x16xf32> to vector<1x8x16xf32>
    %19 = vector.broadcast %18 : vector<1x8x16xf32> to vector<8x8x16xf32>
    %20 = arith.addf %17, %19 : vector<8x8x16xf32>
    %cst_16 = arith.constant 0.000000e+00 : f32
    %21 = vector.broadcast %cst_16 : f32 to vector<8x8x16xf32>
    %22 = arith.maximumf %20, %21 : vector<8x8x16xf32>
    %c0_17 = arith.constant 0 : index
    %c0_18 = arith.constant 0 : index
    %c0_19 = arith.constant 0 : index
    %23 = vector.load %arg8[%c0_17, %c0_18, %c0_19] : memref<8x8x16xf32, #tpu.memory_space<vmem>>, vector<8x8x16xf32>
    tpu.vector_store %arg8[%c0_17, %c0_18, %c0_19], %22 {strides = array<i32>} : memref<8x8x16xf32, #tpu.memory_space<vmem>>, vector<8x8x16xf32>,
    return
  }
  func.func @transform_0(%arg0: i32) -> (i32, i32, i32) {
    %c0_i32 = arith.constant 0 : i32
    %c0_i32_0 = arith.constant 0 : i32
    %c0_i32_1 = arith.constant 0 : i32
    return %arg0, %c0_i32, %c0_i32_0 : i32, i32, i32
  }
  func.func @transform_1(%arg0: i32) -> (i32, i32) {
    %c0_i32 = arith.constant 0 : i32
    %c0_i32_0 = arith.constant 0 : i32
    %c0_i32_1 = arith.constant 0 : i32
    return %c0_i32, %c0_i32_0 : i32, i32
  }
  func.func @transform_2(%arg0: i32) -> (i32, i32) {
    %c0_i32 = arith.constant 0 : i32
    %c0_i32_0 = arith.constant 0 : i32
    %c0_i32_1 = arith.constant 0 : i32
    return %c0_i32, %c0_i32_0 : i32, i32
  }
  func.func @transform_3(%arg0: i32) -> (i32, i32) {
    %c0_i32 = arith.constant 0 : i32
    %c0_i32_0 = arith.constant 0 : i32
    %c0_i32_1 = arith.constant 0 : i32
    return %c0_i32, %c0_i32_0 : i32, i32
  }
  func.func @transform_4(%arg0: i32) -> (i32, i32) {
    %c0_i32 = arith.constant 0 : i32
    %c0_i32_0 = arith.constant 0 : i32
    %c0_i32_1 = arith.constant 0 : i32
    return %c0_i32, %c0_i32_0 : i32, i32
  }
  func.func @transform_5(%arg0: i32) -> (i32, i32) {
    %c0_i32 = arith.constant 0 : i32
    %c0_i32_0 = arith.constant 0 : i32
    %c0_i32_1 = arith.constant 0 : i32
    return %c0_i32, %c0_i32_0 : i32, i32
  }
  func.func @transform_6(%arg0: i32) -> (i32, i32) {
    %c0_i32 = arith.constant 0 : i32
    %c0_i32_0 = arith.constant 0 : i32
    %c0_i32_1 = arith.constant 0 : i32
    return %c0_i32, %c0_i32_0 : i32, i32
  }
  func.func @transform_7(%arg0: i32) -> (i32, i32, i32) {
    %c0_i32 = arith.constant 0 : i32
    %c0_i32_0 = arith.constant 0 : i32
    %c0_i32_1 = arith.constant 0 : i32
    return %arg0, %c0_i32, %c0_i32_0 : i32, i32, i32
  }
}

</mosaic_0001>

<bundles_post_ra>
// kernel: tpu_custom_call.1
= control target key start
LH: loop header
LB: loop body
LE: loop exit
PB: predicated region body
PF: predicated region fallthrough
CT: control target
= control target key end

     0   :  { %6 = vsyncpa [#allocation3], 0  ;;  %s481_s0 = inlined_call_operand.hbm [shape: f32[8,128], index: 0, kind: input, shape index: {}]   ;;  %s482_s1 = inlined_call_operand.hbm [shape: f32[16,128], index: 1, kind: output, shape index: {}]  }
   0x1   :  { %7 = vsyncpa [#allocation4], 0 }
   0x2   :  { %9 = vsyncpa [#allocation4 + $0x1], 0  ;;  %s351_s6 = smov 0   ;;  %s353_s7 = smov 0  }
   0x3   :  { %s355_s8 = smov 0   ;;  %s357_s9 = smov 0  }
   0x4 LB: > { %s372_s10 = sadd.s32 4294967295, %s337_s9   ;;  %s183_s11 = sadd.s32 4294967294, %s337_s9   ;;  %s337_s9 = sphi %s357_s9, %s498_s9   ;;  %s333_s8 = sphi %s355_s8, %s497_s8   ;;  %s329_s7 = sphi %s353_s7, %s496_s7   ;;  %s325_s6 = sphi %s351_s6, %s495_s6  }
   0x5   : > { %s376_s12 = sadd.s32 1, %s337_s9   ;;  %s43_s13 = sadd.s32 1, %s333_s8 }
   0x6   : > { %s40_s14 = ssub.s32 %s337_s9, %s376_s12  ;;  %p53_p0 = scmp.ne.s32.totalorder %s333_s8, %s329_s7 }
   0x7   : > { %p41_p1 = scmp.eq.s32.totalorder %s40_s14, 0  ;;  %p54_p2 = scmp.eq.s32.totalorder %s372_s10, 1 }
   0x8   : > { %p59_p3 = scmp.ne.s32.totalorder %s329_s7, %s325_s6  ;;  %p60_p4 = scmp.eq.s32.totalorder %s183_s11, 1 }
   0x9   : > { %s387_s15 = scalar_select %p41_p1, %s333_s8, %s43_s13  }
   0xa   : > { %p389_p5 = por %p54_p2, %p53_p0  ;;  %p393_p6 = por %p60_p4, %p59_p3 }
   0xb   : > { %p184_p7 = scmp.ge.s32.totalorder %s337_s9, 1  ;;  %p67_p8 = scmp.lt.s32.totalorder %s337_s9, 3 }
   0xc   : > { %s486_s16 = scalar_select %p389_p5, 1, 0 }
   0xd   : > { %s487_s17 = scalar_select %p393_p6, 1, 0 }
   0xe   : > { %p483_p9 = scmp.eq.s32.totalorder %s372_s10, 0  ;;  %p400_p10 = pnand %p184_p7, %p67_p8 }
   0xf   : > { %s339_s19 = smov [#allocation2]   ;;  %s243_s24 = scalar_lea.hbm %s481_s0, 128 }
  0x10   : > { %s488_s18 = scalar_select %p400_p10, 1, 0 }
  0x11   : > { %s80_s20 = sshll.u32 %s339_s19, 4  ;;  %p199_p11 = pneg %p400_p10  ;;  %s81_s20 = int_to_ptr.vmem [resolvable:$true] %s80_s20 }
  0x12   : > { %p244_p13 = scmp.ne.s32.totalorder %s481_s0, %s243_s24  ;;  %p250_p3 = scmp.lt.u32.totalorder %s243_s24, %s481_s0 }
  0x13   : > { %p408_p12 = pnand %p483_p9, %p199_p11 }
  0x15   : > { %p245_p0 = pneg %p408_p12 }
  0x17   : > { %p246_p1 = pnand %p245_p0, %p244_p13 }
  0x19   : > { %p247_p2 = pneg %p246_p1 }
  0x1b   : > { %p252_p4 = pnand %p250_p3, %p247_p2 }
  0x1d   : > { %255 = shalt.err (!%p252_p4)
}
  0x1e   : > { %s256_s29 = scalar_lea.vmem %s81_s20, 128  ;;  %p264_p9 = scmp.lt.s32.totalorder %s81_s20, %s81_s20 }
  0x1f   : > { %p257_p7 = scmp.ne.s32.totalorder %s81_s20, %s256_s29  ;;  %p265_p6 = scmp.lt.s32.totalorder %s256_s29, %s256_s29 }
  0x21   : > { %p259_p8 = pnand %p257_p7, %p245_p0  ;;  %p266_p5 = por %p265_p6, %p264_p9 }
  0x23   : > { %p260_p11 = pneg %p259_p8 }
  0x25   : > { %p267_p10 = pnand %p266_p5, %p260_p11 }
  0x27   : > { %270 = shalt.err (!%p267_p10)
}
  0x28   : > { %202 = dma.hbm_to_vmem [thread:$0]  (!%p408_p12), %s481_s0, 128, %s81_s20, [#allocation3]  }
  0x29   : > { %p490_p13 = scmp.ne.s32.totalorder %s488_s18, 0 }
  0x2a   : > { %p491_p1 = scmp.eq.s32.totalorder (!%p490_p13), %s372_s10, 0 }
  0x2b   : > { %93 = sbr.rel (%p490_p13) target bundleno = 77 (0x4d), region = 24 }
  0x32   : > { %316 = dma.done.wait (%p491_p1), [#allocation3], 128   ;;  %p492_p0 = pmov %p491_p1 }
  0x33   : > { %s105_s3 = sand.u32 1, %s329_s7   ;;  %s190_s13 = sshll.u32 %s372_s10, 7  ;;  %v108_v0 = vld [vmem:[#allocation2] sm:$0xff] }
  0x34   : > { %318 = vsyncadd (%p492_p0), [#allocation3], 4294967168  ;;  %s188_s4 = sshll.u32 %s105_s3, 3  ;;  %s441_s18 = scalar_lea.hbm %s482_s1, %s190_s13 }
  0x35   : > { %s107_s5 = scalar_lea.vmem [#allocation5], %s188_s4  ;;  %s111_s20 = scalar_lea.sflag [#allocation4], %s105_s3 }
  0x36   : > { %s124_s11 = sshll.u32 %s107_s5, 4  ;;  %109 = vst [vmem:[%s107_s5] sm:$0xff] %v108_v0  ;;  %p493_p6 = scmp.ne.s32.totalorder %s486_s16, 0  ;;  %s436_s11 = int_to_ptr.vmem [resolvable:$true] %s124_s11 }
  0x37   : > { %s271_s21 = scalar_lea.vmem %s436_s11, 128  ;;  %s340_s22 = smov [#allocation5]  }
  0x38   : > { %p272_p5 = scmp.ne.s32.totalorder %s436_s11, %s271_s21  ;;  %s275_s10 = sshll.u32 %s340_s22, 4  ;;  %s276_s10 = int_to_ptr.vmem [resolvable:$false] %s275_s10 }
  0x39   : > { %s277_s23 = scalar_lea.vmem %s276_s10, 256  ;;  %p278_p12 = scmp.lt.s32.totalorder %s436_s11, %s276_s10 }
  0x3a   : > { %p273_p9 = pnand %p272_p5, %p493_p6  ;;  %p279_p2 = scmp.lt.s32.totalorder %s277_s23, %s271_s21 }
  0x3c   : > { %p274_p10 = pneg %p273_p9  ;;  %p280_p3 = por %p279_p2, %p278_p12 }
  0x3e   : > { %p281_p4 = pnand %p280_p3, %p274_p10 }
  0x40   : > { %284 = shalt.err (!%p281_p4)
}
  0x41   : > { %s285_s24 = scalar_lea.hbm %s441_s18, 128  ;;  %s289_s27 = scalar_lea.hbm %s482_s1, 256 }
  0x42   : > { %p286_p7 = scmp.ne.s32.totalorder %s441_s18, %s285_s24  ;;  %p290_p13 = scmp.lt.u32.totalorder %s441_s18, %s482_s1 }
  0x43   : > { %p291_p1 = scmp.lt.u32.totalorder %s289_s27, %s285_s24  ;;  %p293_p5 = scmp.lt.u32.totalorder %s285_s24, %s441_s18 }
  0x44   : > { %p287_p8 = pnand %p286_p7, %p493_p6 }
  0x45   : > { %p292_p0 = por %p291_p1, %p290_p13 }
  0x46   : > { %p288_p11 = pneg %p287_p8 }
  0x47   : > { %p294_p9 = por %p293_p5, %p292_p0 }
  0x49   : > { %p295_p10 = pnand %p294_p9, %p288_p11 }
  0x4b   : > { %298 = shalt.err (!%p295_p10)
}
  0x4c   : > { %197 = dma.vmem_to_hbm [thread:$0]  (%p493_p6), %s436_s11, 128, %s441_s18, %s111_s20  }
  0x4d PF: > { %p209_p12 = scmp.ge.s32.totalorder %s337_s9, 2  ;;  %s136_s30 = sand.u32 1, %s325_s6  }
  0x4e   : > { %p494_p2 = scmp.ne.s32.totalorder %s487_s17, 0  ;;  %s137_s2 = scalar_lea.sflag [#allocation4], %s136_s30 }
  0x50   : > { %p204_p3 = pnand %p209_p12, %p494_p2 }
  0x52   : > { %320 = dma.done.wait (!%p204_p3), %s137_s2, 128  }
  0x53   : > { %322 = vsyncadd (!%p204_p3), %s137_s2, 4294967168  ;;  %p12_p4 = scmp.ge.s32.totalorder %s376_s12, 4   ;;  %s495_s6 = smov %s329_s7 }
  0x54   : > { %s496_s7 = smov %s333_s8  ;;  %s497_s8 = smov %s387_s15 }
  0x55   : > { %s498_s9 = smov %s376_s12  ;;  %14 = sbr.rel (!%p12_p4) target bundleno = 4 (0x4), region = 61 }
  0x5c   :  { %142 = vsyncpa [#allocation3], 1 }
  0x5d   :  { %144 = vsyncpa [#allocation3 + $0x1], 1 }
  0x5e   :  { %145 = vsyncpa [#allocation4], 1 }
  0x5f   :  { %147 = vsyncpa [#allocation4 + $0x1], 1 }

// kernel: tpu_custom_call.1
= control target key start
LH: loop header
LB: loop body
LE: loop exit
PB: predicated region body
PF: predicated region fallthrough
CT: control target
= control target key end

     0   :  { %12 = vsyncpa [#allocation3], 0  ;;  %s931_s0 = inlined_call_operand.vmem [shape: f32[16,8,4], index: 0, kind: input, shape index: {}]   ;;  %s932_s1 = inlined_call_operand.vmem [shape: f32[8,4], index: 1, kind: input, shape index: {}]   ;;  %s933_s2 = inlined_call_operand.vmem [shape: f32[8,4], index: 2, kind: input, shape index: {}]   ;;  %s934_s3 = inlined_call_operand.vmem [shape: bf16[4,16], index: 3, kind: input, shape index: {}]   ;;  %s935_s4 = inlined_call_operand.vmem [shape: bf16[4,16], index: 4, kind: input, shape index: {}]   ;;  %s936_s5 = inlined_call_operand.vmem [shape: bf16[4,16], index: 5, kind: input, shape index: {}]   ;;  %s937_s6 = inlined_call_operand.vmem [shape: f32[1,16], index: 6, kind: input, shape index: {}]   ;;  %s938_s7 = inlined_call_operand.hbm [shape: f32[16,8,16], index: 7, kind: output, shape index: {}]  }
   0x1   :  { %14 = vsyncpa [#allocation3 + $0x1], 0  ;;  %s787_s24 = smov 0   ;;  %s789_s25 = smov 0  }
   0x2   :  { %s791_s26 = smov 0   ;;  %s793_s27 = smov 0  }
   0x3 LB: > { %s808_s28 = sadd.s32 4294967295, %s740_s27   ;;  %s583_s29 = sadd.s32 4294967294, %s740_s27   ;;  %s740_s27 = sphi %s793_s27, %s944_s27   ;;  %s736_s26 = sphi %s791_s26, %s943_s26   ;;  %s732_s25 = sphi %s789_s25, %s942_s25   ;;  %s728_s24 = sphi %s787_s24, %s941_s24  }
   0x4   : > { %s812_s30 = sadd.s32 1, %s740_s27   ;;  %s179_s8 = sadd.s32 1, %s736_s26 }
   0x5   : > { %s176_s9 = ssub.s32 %s740_s27, %s812_s30  ;;  %p189_p0 = scmp.ne.s32.totalorder %s736_s26, %s732_s25 }
   0x6   : > { %p177_p1 = scmp.eq.s32.totalorder %s176_s9, 0  ;;  %p190_p2 = scmp.eq.s32.totalorder %s808_s28, 1 }
   0x7   : > { %p195_p3 = scmp.ne.s32.totalorder %s732_s25, %s728_s24  ;;  %p196_p4 = scmp.eq.s32.totalorder %s583_s29, 1 }
   0x8   : > { %s823_s10 = scalar_select %p177_p1, %s736_s26, %s179_s8  }
   0x9   : > { %p825_p5 = por %p190_p2, %p189_p0  ;;  %p829_p6 = por %p196_p4, %p195_p3 }
   0xa   : > { %p586_p7 = scmp.ge.s32.totalorder %s740_s27, 1  ;;  %p241_p8 = scmp.lt.s32.totalorder %s740_s27, 3 }
   0xc   : > { %p242_p9 = pnand %p586_p7, %p241_p8 }
   0xd   : > { %v286_v0 = vld [vmem:[%s936_s5] sm:$0x3] (!%p242_p9)  ;;  %vm291_vm0 = vcmask (!%p242_p9), 1041408   ;;  %v742_v2 = vmov (!%p242_p9), 0.0   ;;  %vm743_vm1 = vmmov (!%p242_p9), 0   ;;  %vm287_vm2 = vcmask (!%p242_p9), 31744  }
   0xe   : > { %245 = sbr.rel (%p242_p9) target bundleno = 270 (0x10e), region = 48  ;;  %v284_v1 = vld [vmem:[%s933_s2] sm:$0xff] (!%p242_p9)  ;;  %612 = vmatprep.subr.bf16.mxu1 (!%p242_p9), %v742_v2  ;;  %v293_v3 = vsel (!%p242_p9), %vm291_vm0, %v286_v0, 0  ;;  %614 = vmatprep.mubr.msk.bf16.mxu1 (!%p242_p9), %vm743_vm1, %v742_v2  ;;  %s588_s21 = sshll.u32 (!%p242_p9), %s808_s28, 3  ;;  %vm498_vm3 = vcmask (!%p242_p9), 130048  }
   0xf   : > { %v285_v4 = vpack.c.bf16 (!%p242_p9), %v284_v1, %v284_v1  ;;  %v401_v5 = vld [vmem:[%s934_s3] sm:$0x3] (!%p242_p9)  ;;  %613 = vmatpush3.bf16.msra.mxu1 (!%p242_p9), %v293_v3  ;;  %p274_p10 = scmp.lt.s32.totalorder (!%p242_p9), %s588_s21, 15  ;;  %s270_s16 = sand.u32 (!%p242_p9), 1, %s732_s25  }
  0x10   : > { %v283_v6 = vld [vmem:[%s935_s4] sm:$0x3] (!%p242_p9)  ;;  %634 = vmatprep.subr.msk.bf16.mxu0 (!%p242_p9), %vm291_vm0, %v401_v5  ;;  %v415_v7 = vsel (!%p242_p9), %vm291_vm0, %v401_v5, 0  ;;  %618 = vmatprep.subr.bf16.mxu1 (!%p242_p9), %v742_v2  ;;  %s587_s17 = sshll.u32 (!%p242_p9), %s270_s16, 6  ;;  %s602_s19 = sshll.u32 (!%p242_p9), %s808_s28, 10 }
  0x11   : > { %625 = vmatpush3.bf16.msra.mxu0 (!%p242_p9), %v415_v7  ;;  %v339_v8 = vsel (!%p242_p9), %vm291_vm0, %v283_v6, 0  ;;  %v281_v9 = vld [vmem:[%s932_s1] sm:$0xff] (!%p242_p9)  ;;  %s272_s18 = scalar_lea.vmem (!%p242_p9), [#allocation2], %s587_s17  ;;  %s881_s23 = scalar_lea.hbm (!%p242_p9), %s938_s7, %s602_s19 }
  0x12   : > { %615 = vmatmul.mubr.msk.bf16.vlgmr.msra.gmra.mrb[0].mxu1 (!%p242_p9), %vm287_vm2, %v285_v4  ;;  %v282_v13 = vpack.c.bf16 (!%p242_p9), %v281_v9, %v281_v9  ;;  %v592_v29 = vld [vmem:[%s937_s6] ss:$0 sm:$0xff] (!%p242_p9)  ;;  %s521_s20 = sshll.u32 (!%p242_p9), %s272_s18, 4  ;;  %s890_s28 = scalar_lea.sflag (!%p242_p9), [#allocation3], %s270_s16  ;;  %s883_s20 = int_to_ptr.vmem [resolvable:$true] %s521_s20 }
  0x13   : > { %619 = vmatpush3.bf16.msra.mxu1 (!%p242_p9), %v339_v8  ;;  %620 = vmatprep.mubr.msk.bf16.mxu1 (!%p242_p9), %vm743_vm1, %v742_v2  ;;  %s744_s8 = smov (!%p242_p9), [#allocation2]  }
  0x14   : > { %s682_s9 = sshll.u32 (!%p242_p9), %s744_s8, 4  ;;  %s683_s9 = int_to_ptr.vmem [resolvable:$false] %s682_s9 }
  0x15   : > { %s946_s21 = smov (!%p274_p10, %s588_s21), 15  ;;  %p685_p0 = scmp.lt.s32.totalorder %s883_s20, %s683_s9 }
  0x16   : > { %s589_s29 = sshll.u32 %s946_s21, 3 }
  0x17   : > { %s277_s13 = scalar_lea.vmem %s931_s0, %s589_s29  ;;  %s678_s29 = scalar_lea.vmem %s883_s20, 1024 }
  0x18   : > { %v389_v10 = vld [vmem:[%s277_s13] sm:$0xff]  ;;  %v390_v11 = vld [vmem:[%s277_s13 + $0x8] sm:$0xff]  ;;  %v391_v12 = vld [vmem:[%s277_s13 + $0x10] sm:$0xff]  ;;  %p679_p11 = scmp.ne.s32.totalorder %s883_s20, %s678_s29 }
  0x19   : > { %v397_v14 = vpack.c.bf16 %v390_v11, %v389_v10  ;;  %v392_v15 = vld [vmem:[%s277_s13 + $0x18] sm:$0xff]  ;;  %v393_v16 = vld [vmem:[%s277_s13 + $0x20] sm:$0xff]  ;;  %v394_v17 = vld [vmem:[%s277_s13 + $0x28] sm:$0xff] }
  0x1a   : > { %v398_v18 = vpack.c.bf16 %v392_v15, %v391_v12  ;;  %v399_v19 = vpack.c.bf16 %v394_v17, %v393_v16  ;;  %621 = vmatmul.mubr.msk.bf16.vlgmr.msra.gmra.mrb[4].mxu1 %vm287_vm2, %v282_v13  ;;  %v395_v20 = vld [vmem:[%s277_s13 + $0x30] sm:$0xff]  ;;  %v396_v21 = vld [vmem:[%s277_s13 + $0x38] sm:$0xff]  ;;  %p680_p12 = pnand %p679_p11, %p825_p5  ;;  %s684_s13 = scalar_lea.vmem %s683_s9, 2048 }
  0x1b   : > { %626 = vmatprep.mubr.msk.bf16.mxu0 %vm287_vm2, %v397_v14  ;;  %v400_v22 = vpack.c.bf16 %v396_v21, %v395_v20  ;;  %p686_p1 = scmp.lt.s32.totalorder %s684_s13, %s678_s29 }
  0x1c   : > { %627 = vmatmul.mubr.msk.bf16.vlgmr.msra.gmra.mrb[0].mxu0 %vm287_vm2, %v398_v18  ;;  %p681_p13 = pneg %p680_p12 }
  0x1d   : > { %630 = vmatprep.mubr.msk.bf16.mxu0 %vm287_vm2, %v399_v19  ;;  %p687_p2 = por %p686_p1, %p685_p0 }
  0x1f   : > { %p688_p3 = pnand %p687_p2, %p681_p13 }
  0x24   : > { %631 = vmatmul.mubr.msk.bf16.gmra.mrb[4].mxu0 %vm287_vm2, %v400_v22 }
  0xe5   : > { %v329_v23 = vpop.f32.mrb[0].mxu1 }
  0xe6   : > { %v616_v24 = vpop.f32.mrb[1].mxu1 }
  0xe7   : > { %v332_v25 = vpop.f32.mrb[2].mxu1 }
  0xe8   : > { %v617_v26 = vpop.f32.mrb[3].mxu1 }
  0xed   : > { %v375_v28 = vpop.f32.mrb[4].mxu1 }
  0xee   : > { %v376_v31 = vadd.f32 %v375_v28, %v329_v23  ;;  %v622_v32 = vpop.f32.mrb[5].mxu1 }
  0xef   : > { %v628_v27 = vpop.f32.mrb[0].mxu0  ;;  %v378_v34 = vpop.f32.mrb[6].mxu1 }
  0xf0   : > { %v451_v30 = vpop.f32.mrb[1].mxu0  ;;  %v388_v35 = vadd.f32 %v592_v29, %v376_v31  ;;  %v623_v37 = vpop.f32.mrb[7].mxu1 }
  0xf1   : > { %v629_v33 = vpop.f32.mrb[2].mxu0 }
  0xf2   : > { %v454_v36 = vpop.f32.mrb[3].mxu0  ;;  %v482_v38 = vadd.f32 %v451_v30, %v388_v35  ;;  %v484_v39 = vadd.f32 %v628_v27, %v388_v35  ;;  %v485_v40 = vadd.f32 %v629_v33, %v388_v35 }
  0xf3   : > { %v483_v41 = vadd.f32 %v454_v36, %v388_v35 }
  0xf4   : > { %v490_v42 = vmax.f32 %v482_v38, 0.0  ;;  %v492_v43 = vmax.f32 %v484_v39, 0.0  ;;  %v493_v44 = vmax.f32 %v485_v40, 0.0 }
  0xf5   : > { %v491_v45 = vmax.f32 %v483_v41, 0.0 }
  0xf6   : > { %499 = vst.msk [vmem:[%s272_s18] sm:$0xff] %vm498_vm3, %v490_v42  ;;  %501 = vst.msk [vmem:[%s272_s18 + $0x10] sm:$0xff] %vm498_vm3, %v492_v43 }
  0xf7   : > { %v632_v46 = vpop.f32.mrb[4].mxu0  ;;  %502 = vst.msk [vmem:[%s272_s18 + $0x18] sm:$0xff] %vm498_vm3, %v493_v44  ;;  %500 = vst.msk [vmem:[%s272_s18 + $0x8] sm:$0xff] %vm498_vm3, %v491_v45 }
  0xf8   : > { %v488_v47 = vadd.f32 %v632_v46, %v388_v35  ;;  %v467_v48 = vpop.f32.mrb[5].mxu0 }
  0xf9   : > { %v486_v49 = vadd.f32 %v467_v48, %v388_v35  ;;  %v633_v50 = vpop.f32.mrb[6].mxu0 }
  0xfa   : > { %v496_v51 = vmax.f32 %v488_v47, 0.0  ;;  %v489_v52 = vadd.f32 %v633_v50, %v388_v35  ;;  %v470_v53 = vpop.f32.mrb[7].mxu0 }
  0xfb   : > { %v494_v54 = vmax.f32 %v486_v49, 0.0  ;;  %v487_v55 = vadd.f32 %v470_v53, %v388_v35 }
  0xfc   : > { %505 = vst.msk [vmem:[%s272_s18 + $0x30] sm:$0xff] %vm498_vm3, %v496_v51  ;;  %v497_v56 = vmax.f32 %v489_v52, 0.0 }
  0xfd   : > { %503 = vst.msk [vmem:[%s272_s18 + $0x20] sm:$0xff] %vm498_vm3, %v494_v54  ;;  %v495_v57 = vmax.f32 %v487_v55, 0.0 }
  0xfe   : > { %506 = vst.msk [vmem:[%s272_s18 + $0x38] sm:$0xff] %vm498_vm3, %v497_v56 }
  0xff   : > { %504 = vst.msk [vmem:[%s272_s18 + $0x28] sm:$0xff] %vm498_vm3, %v495_v57 }
 0x100   : > { %691 = shalt.err (!%p688_p3)
}
 0x101   : > { %s692_s14 = scalar_lea.hbm %s881_s23, 1024  ;;  %s696_s17 = scalar_lea.hbm %s938_s7, 2048 }
 0x102   : > { %p693_p4 = scmp.ne.s32.totalorder %s881_s23, %s692_s14  ;;  %p697_p9 = scmp.lt.u32.totalorder %s881_s23, %s938_s7 }
 0x103   : > { %p698_p10 = scmp.lt.u32.totalorder %s696_s17, %s692_s14  ;;  %p700_p12 = scmp.lt.u32.totalorder %s692_s14, %s881_s23 }
 0x104   : > { %p694_p7 = pnand %p693_p4, %p825_p5 }
 0x105   : > { %p699_p11 = por %p698_p10, %p697_p9 }
 0x106   : > { %p695_p8 = pneg %p694_p7 }
 0x107   : > { %p701_p13 = por %p700_p12, %p699_p11 }
 0x109   : > { %p702_p0 = pnand %p701_p13, %p695_p8 }
 0x10b   : > { %705 = shalt.err (!%p702_p0)
}
 0x10c   : > { %s745_s21 = smov 128   ;;  %s746_s22 = smov 8  }
 0x10d   : > { %635 = dma.vmem_to_hbm [thread:$0]  (%p825_p5), %s883_s20, 1024, %s881_s23, %s890_s28, %s745_s21, %s745_s21, %s746_s22  }
 0x10e PF: > { %p641_p1 = scmp.ge.s32.totalorder %s740_s27, 2  ;;  %s536_s29 = sand.u32 1, %s728_s24  }
 0x10f   : > { %s537_s8 = scalar_lea.sflag [#allocation3], %s536_s29 }
 0x110   : > { %p638_p2 = pnand %p641_p1, %p829_p6 }
 0x112   : > { %723 = dma.done.wait (!%p638_p2), %s537_s8, 1024  }
 0x113   : > { %725 = vsyncadd (!%p638_p2), %s537_s8, 4294966272  ;;  %p17_p3 = scmp.ge.s32.totalorder %s812_s30, 4   ;;  %s941_s24 = smov %s732_s25 }
 0x114   : > { %s942_s25 = smov %s736_s26  ;;  %s943_s26 = smov %s823_s10 }
 0x115   : > { %s944_s27 = smov %s812_s30  ;;  %19 = sbr.rel (!%p17_p3) target bundleno = 3 (0x3), region = 83 }
 0x11c   :  { %542 = vsyncpa [#allocation3], 1 }
 0x11d   :  { %544 = vsyncpa [#allocation3 + $0x1], 1 }

</bundles_post_ra>
